<compile_context>
chip_gen: v6e
topology: v6e:2x2x1
jax: 0.10.0
libtpu: 0.0.40
codegen_flags: <defaults>
</compile_context>

<pallas_src>
import functools

import jax
import jax.numpy as jnp
from jax.experimental import pallas as pl
from jax.experimental.pallas import tpu as pltpu


def _residual_block_kernel(
    xs_ref,    # (3*Cin, Tn)      stacked dilation-shifted views of padded input
    x_ref,     # (Cin,   Tn)      unpadded input (residual path)
    w1_ref,    # (2*Cout, 3*Cin)  stacked conv1_1 / conv1_2 weights (tap-major K)
    b1_ref,    # (2*Cout, 1)
    w2_ref,    # (2*Cout, Cout)   stacked conv2_1 / conv2_2 (1x1) weights
    b2_ref,    # (2*Cout, 1)
    res_ref,   # (Cout, Tn)
    skip_ref,  # (Cout, Tn)
    *,
    cout: int,
):
    # Both dilated convs in one MXU matmul: (2*Cout, 3*Cin) @ (3*Cin, Tn).
    pre = (
        jnp.dot(w1_ref[...], xs_ref[...], preferred_element_type=jnp.float32)
        + b1_ref[...]
    )
    gate_t = jnp.tanh(pre[:cout, :])
    # sigmoid(x) == 0.5 * (1 + tanh(0.5 * x))  -> single EUP op per element.
    gate_s = 0.5 * (1.0 + jnp.tanh(0.5 * pre[cout:, :]))
    gated = gate_t * gate_s                                   # (Cout, Tn) f32

    # Both 1x1 convs in one MXU matmul: (2*Cout, Cout) @ (Cout, Tn).
    out = (
        jnp.dot(w2_ref[...], gated, preferred_element_type=jnp.float32)
        + b2_ref[...]
    )
    res_ref[...] = (out[:cout, :] + x_ref[...].astype(jnp.float32)).astype(
        res_ref.dtype
    )
    skip_ref[...] = out[cout:, :].astype(skip_ref.dtype)


def _pick_lane_tile(n, max_tile=1024):
    """Largest 128-multiple tile dividing n; prefer >=2 tiles (v7x has 2 TCs)."""
    if n % 128 != 0:
        return n                      # single full block (block == array dim is legal)
    upper = n // 2 if n >= 256 else n
    upper = max(128, min(max_tile, upper)) // 128 * 128
    for t in range(upper, 127, -128):
        if n % t == 0:
            return t
    return n


def residual_block(x, params, dilation):
    """x: (B, Cin, L) float32.  params: dict of conv weights/biases."""
    B, Cin, L = x.shape
    w11, b11 = params["w11"], params["b11"]
    w12, b12 = params["w12"], params["b12"]
    w21, b21 = params["w21"], params["b21"]
    w22, b22 = params["w22"], params["b22"]
    Cout = w11.shape[0]
    N = B * L

    # ---- Wrapper-side layout work (cheap XLA glue, fused by the compiler) ----
    # Fold batch into the lane axis: channels on sublanes, B*L on lanes.
    xT = jnp.transpose(x, (1, 0, 2))                  # (Cin, B, L)
    x_flat = xT.reshape(Cin, N)

    # Three dilation-shifted views; per-batch zero padding fused into the same
    # op chain (no standalone padded activation pass feeding the kernel).
    xT_pad = jnp.pad(xT, ((0, 0), (0, 0), (dilation, dilation)))
    xs = jnp.concatenate(
        [xT_pad[:, :, k * dilation : k * dilation + L] for k in range(3)],
        axis=0,
    ).reshape(3 * Cin, N)                             # rows: tap-major, then Cin

    # Stack both k=3 convs along output channels; flatten taps into K
    # (tap-major so it matches the xs row order).
    def flat_k3(w):                                   # (Cout, Cin, 3) -> (Cout, 3*Cin)
        return jnp.transpose(w, (0, 2, 1)).reshape(Cout, 3 * Cin)

    w1 = jnp.concatenate([flat_k3(w11), flat_k3(w12)], axis=0)      # (2*Cout, 3*Cin)
    b1 = jnp.concatenate([b11, b12]).reshape(2 * Cout, 1)
    w2 = jnp.concatenate(
        [w21.reshape(Cout, Cout), w22.reshape(Cout, Cout)], axis=0  # (2*Cout, Cout)
    )
    b2 = jnp.concatenate([b21, b22]).reshape(2 * Cout, 1)

    tile_n = _pick_lane_tile(N)
    grid = (N // tile_n,)

    kernel = functools.partial(_residual_block_kernel, cout=Cout)
    lane_tiled = lambda rows: pl.BlockSpec((rows, tile_n), lambda j: (0, j))
    whole = lambda shape: pl.BlockSpec(shape, lambda j: (0,) * len(shape))

    res_flat, skip_flat = pl.pallas_call(
        kernel,
        out_shape=(
            jax.ShapeDtypeStruct((Cout, N), x.dtype),
            jax.ShapeDtypeStruct((Cout, N), x.dtype),
        ),
        grid_spec=pltpu.PrefetchScalarGridSpec(
            num_scalar_prefetch=0,
            grid=grid,
            in_specs=[
                lane_tiled(3 * Cin),         # xs (stacked shifted input)
                lane_tiled(Cin),             # x  (residual path)
                whole((2 * Cout, 3 * Cin)),  # w1
                whole((2 * Cout, 1)),        # b1
                whole((2 * Cout, Cout)),     # w2
                whole((2 * Cout, 1)),        # b2
            ],
            out_specs=[
                lane_tiled(Cout),            # residual_out
                lane_tiled(Cout),            # skip_out
            ],
        ),
        compiler_params=pltpu.CompilerParams(
            dimension_semantics=("parallel",),
            vmem_limit_bytes=48 * 1024 * 1024,
        ),
    )(xs, x_flat, w1, b1, w2, b2)

    # Unfold lanes back to (B, Cout, L).
    res = jnp.transpose(res_flat.reshape(Cout, B, L), (1, 0, 2))
    skip = jnp.transpose(skip_flat.reshape(Cout, B, L), (1, 0, 2))
    return res, skip


def _init_params(key, in_channels, out_channels):
    """Deterministic PyTorch-style (uniform fan-in) init for all four convs."""
    ks = jax.random.split(key, 8)

    def conv_init(kw, kb, cin, ksize, cout):
        bound = 1.0 / jnp.sqrt(cin * ksize)
        w = jax.random.uniform(kw, (cout, cin, ksize), jnp.float32, -bound, bound)
        b = jax.random.uniform(kb, (cout,), jnp.float32, -bound, bound)
        return w, b

    w11, b11 = conv_init(ks[0], ks[1], in_channels, 3, out_channels)
    w12, b12 = conv_init(ks[2], ks[3], in_channels, 3, out_channels)
    w21, b21 = conv_init(ks[4], ks[5], out_channels, 1, out_channels)
    w22, b22 = conv_init(ks[6], ks[7], out_channels, 1, out_channels)
    return dict(w11=w11, b11=b11, w12=w12, b12=b12,
                w21=w21, b21=b21, w22=w22, b22=b22)


def _reference(x, params, dilation):
    """Plain-JAX reference (mirrors torch.nn.Conv1d semantics)."""
    def conv1d(x, w, b, dil, pad):
        out = jax.lax.conv_general_dilated(
            x, w, window_strides=(1,), padding=[(pad, pad)],
            rhs_dilation=(dil,),
            dimension_numbers=("NCH", "OIH", "NCH"),
        )
        return out + b[None, :, None]

    b1 = jnp.tanh(conv1d(x, params["w11"], params["b11"], dilation, dilation))
    b2 = jax.nn.sigmoid(conv1d(x, params["w12"], params["b12"], dilation, dilation))
    g = b1 * b2
    r = conv1d(g, params["w21"], params["b21"], 1, 0) + x
    s = conv1d(g, params["w22"], params["b22"], 1, 0)
    return r, s


if __name__ == "__main__":
    key = jax.random.PRNGKey(0)
    kx, kp = jax.random.split(key)

    # Residual add requires in_channels == out_channels.
    B, C, L, dilation = 2, 8, 128, 2
    x = jax.random.normal(kx, (B, C, L), jnp.float32)
    params = _init_params(kp, C, C)

    res, skip = residual_block(x, params, dilation)
    jax.block_until_ready((res, skip))

    res_ref, skip_ref = _reference(x, params, dilation)
    assert jnp.allclose(res, res_ref, atol=1e-4, rtol=1e-4)
    assert jnp.allclose(skip, skip_ref, atol=1e-4, rtol=1e-4)

    print("KERNEL_OK")
</pallas_src>

<mosaic_0001>
module attributes {stable_mosaic.version = 11 : i64} {
  func.func @_residual_block_kernel(%arg0: i32, %arg1: memref<24x128xf32, #tpu.memory_space<vmem>>, %arg2: memref<8x128xf32, #tpu.memory_space<vmem>>, %arg3: memref<16x24xf32, #tpu.memory_space<vmem>>, %arg4: memref<16x1xf32, #tpu.memory_space<vmem>>, %arg5: memref<16x8xf32, #tpu.memory_space<vmem>>, %arg6: memref<16x1xf32, #tpu.memory_space<vmem>>, %arg7: memref<8x128xf32, #tpu.memory_space<vmem>>, %arg8: memref<8x128xf32, #tpu.memory_space<vmem>>) attributes {dimension_semantics = [#tpu.dimension_semantics<parallel>], iteration_bounds = array<i64: 2>, scalar_prefetch = 0 : i64, scratch_operands = 0 : i64, tpu.core_type = #tpu.core_type<tc>, window_params = [{transform_indices = @transform_0, window_bounds = array<i64: 24, 128>}, {transform_indices = @transform_1, window_bounds = array<i64: 8, 128>}, {pipeline_mode = #tpu.pipeline_mode<synchronous>, transform_indices = @transform_2, window_bounds = array<i64: 16, 24>}, {pipeline_mode = #tpu.pipeline_mode<synchronous>, transform_indices = @transform_3, window_bounds = array<i64: 16, 1>}, {pipeline_mode = #tpu.pipeline_mode<synchronous>, transform_indices = @transform_4, window_bounds = array<i64: 16, 8>}, {pipeline_mode = #tpu.pipeline_mode<synchronous>, transform_indices = @transform_5, window_bounds = array<i64: 16, 1>}, {transform_indices = @transform_6, window_bounds = array<i64: 8, 128>}, {transform_indices = @transform_7, window_bounds = array<i64: 8, 128>}]} {
    %c0 = arith.constant 0 : index
    %c0_0 = arith.constant 0 : index
    %0 = vector.load %arg3[%c0, %c0_0] : memref<16x24xf32, #tpu.memory_space<vmem>>, vector<16x24xf32>
    %c0_1 = arith.constant 0 : index
    %c0_2 = arith.constant 0 : index
    %1 = vector.load %arg1[%c0_1, %c0_2] : memref<24x128xf32, #tpu.memory_space<vmem>>, vector<24x128xf32>
    %cst = arith.constant dense<0.000000e+00> : vector<16x128xf32>
    %2 = tpu.matmul %0, %1, %cst {dimension_numbers = #tpu.dot_dimension_numbers<[1], [0], [0], [1], [0, 0, 1, 1], [], []>} : vector<16x24xf32>, vector<24x128xf32>, vector<16x128xf32> -> vector<16x128xf32>
    %c0_3 = arith.constant 0 : index
    %c0_4 = arith.constant 0 : index
    %3 = vector.load %arg4[%c0_3, %c0_4] : memref<16x1xf32, #tpu.memory_space<vmem>>, vector<16x1xf32>
    %4 = vector.broadcast %3 : vector<16x1xf32> to vector<16x128xf32>
    %5 = arith.addf %2, %4 : vector<16x128xf32>
    %6 = vector.extract_strided_slice %5 {offsets = [0, 0], sizes = [8, 128], strides = [1, 1]} : vector<16x128xf32> to vector<8x128xf32>
    %7 = math.tanh %6 : vector<8x128xf32>
    %8 = vector.extract_strided_slice %5 {offsets = [8, 0], sizes = [8, 128], strides = [1, 1]} : vector<16x128xf32> to vector<8x128xf32>
    %cst_5 = arith.constant 5.000000e-01 : f32
    %9 = vector.broadcast %cst_5 : f32 to vector<8x128xf32>
    %10 = arith.mulf %9, %8 : vector<8x128xf32>
    %11 = math.tanh %10 : vector<8x128xf32>
    %cst_6 = arith.constant 1.000000e+00 : f32
    %12 = vector.broadcast %cst_6 : f32 to vector<8x128xf32>
    %13 = arith.addf %12, %11 : vector<8x128xf32>
    %cst_7 = arith.constant 5.000000e-01 : f32
    %14 = vector.broadcast %cst_7 : f32 to vector<8x128xf32>
    %15 = arith.mulf %14, %13 : vector<8x128xf32>
    %16 = arith.mulf %7, %15 : vector<8x128xf32>
    %c0_8 = arith.constant 0 : index
    %c0_9 = arith.constant 0 : index
    %17 = vector.load %arg5[%c0_8, %c0_9] : memref<16x8xf32, #tpu.memory_space<vmem>>, vector<16x8xf32>
    %cst_10 = arith.constant dense<0.000000e+00> : vector<16x128xf32>
    %18 = tpu.matmul %17, %16, %cst_10 {dimension_numbers = #tpu.dot_dimension_numbers<[1], [0], [0], [1], [0, 0, 1, 1], [], []>} : vector<16x8xf32>, vector<8x128xf32>, vector<16x128xf32> -> vector<16x128xf32>
    %c0_11 = arith.constant 0 : index
    %c0_12 = arith.constant 0 : index
    %19 = vector.load %arg6[%c0_11, %c0_12] : memref<16x1xf32, #tpu.memory_space<vmem>>, vector<16x1xf32>
    %20 = vector.broadcast %19 : vector<16x1xf32> to vector<16x128xf32>
    %21 = arith.addf %18, %20 : vector<16x128xf32>
    %22 = vector.extract_strided_slice %21 {offsets = [0, 0], sizes = [8, 128], strides = [1, 1]} : vector<16x128xf32> to vector<8x128xf32>
    %c0_13 = arith.constant 0 : index
    %c0_14 = arith.constant 0 : index
    %23 = vector.load %arg2[%c0_13, %c0_14] : memref<8x128xf32, #tpu.memory_space<vmem>>, vector<8x128xf32>
    %24 = arith.addf %22, %23 : vector<8x128xf32>
    %c0_15 = arith.constant 0 : index
    %c0_16 = arith.constant 0 : index
    %25 = vector.load %arg7[%c0_15, %c0_16] : memref<8x128xf32, #tpu.memory_space<vmem>>, vector<8x128xf32>
    tpu.vector_store %arg7[%c0_15, %c0_16], %24 {strides = array<i32>} : memref<8x128xf32, #tpu.memory_space<vmem>>, vector<8x128xf32>,
    %26 = vector.extract_strided_slice %21 {offsets = [8, 0], sizes = [8, 128], strides = [1, 1]} : vector<16x128xf32> to vector<8x128xf32>
    %c0_17 = arith.constant 0 : index
    %c0_18 = arith.constant 0 : index
    %27 = vector.load %arg8[%c0_17, %c0_18] : memref<8x128xf32, #tpu.memory_space<vmem>>, vector<8x128xf32>
    tpu.vector_store %arg8[%c0_17, %c0_18], %26 {strides = array<i32>} : memref<8x128xf32, #tpu.memory_space<vmem>>, vector<8x128xf32>,
    return
  }
  func.func @transform_0(%arg0: i32) -> (i32, i32) {
    %c0_i32 = arith.constant 0 : i32
    %c0_i32_0 = arith.constant 0 : i32
    return %c0_i32, %arg0 : i32, i32
  }
  func.func @transform_1(%arg0: i32) -> (i32, i32) {
    %c0_i32 = arith.constant 0 : i32
    %c0_i32_0 = arith.constant 0 : i32
    return %c0_i32, %arg0 : i32, i32
  }
  func.func @transform_2(%arg0: i32) -> (i32, i32) {
    %c0_i32 = arith.constant 0 : i32
    %c0_i32_0 = arith.constant 0 : i32
    %c0_i32_1 = arith.constant 0 : i32
    return %c0_i32, %c0_i32_0 : i32, i32
  }
  func.func @transform_3(%arg0: i32) -> (i32, i32) {
    %c0_i32 = arith.constant 0 : i32
    %c0_i32_0 = arith.constant 0 : i32
    %c0_i32_1 = arith.constant 0 : i32
    return %c0_i32, %c0_i32_0 : i32, i32
  }
  func.func @transform_4(%arg0: i32) -> (i32, i32) {
    %c0_i32 = arith.constant 0 : i32
    %c0_i32_0 = arith.constant 0 : i32
    %c0_i32_1 = arith.constant 0 : i32
    return %c0_i32, %c0_i32_0 : i32, i32
  }
  func.func @transform_5(%arg0: i32) -> (i32, i32) {
    %c0_i32 = arith.constant 0 : i32
    %c0_i32_0 = arith.constant 0 : i32
    %c0_i32_1 = arith.constant 0 : i32
    return %c0_i32, %c0_i32_0 : i32, i32
  }
  func.func @transform_6(%arg0: i32) -> (i32, i32) {
    %c0_i32 = arith.constant 0 : i32
    %c0_i32_0 = arith.constant 0 : i32
    return %c0_i32, %arg0 : i32, i32
  }
  func.func @transform_7(%arg0: i32) -> (i32, i32) {
    %c0_i32 = arith.constant 0 : i32
    %c0_i32_0 = arith.constant 0 : i32
    return %c0_i32, %arg0 : i32, i32
  }
}

</mosaic_0001>

<bundles_post_ra>
// kernel: tpu_custom_call.1
= control target key start
LH: loop header
LB: loop body
LE: loop exit
PB: predicated region body
PF: predicated region fallthrough
CT: control target
= control target key end

     0   :  { %s1284_s0 = inlined_call_operand.vmem [shape: f32[24,256], index: 0, kind: input, shape index: {}]   ;;  %s1285_s1 = inlined_call_operand.hbm [shape: f32[8,256], index: 1, kind: input, shape index: {}]   ;;  %s1286_s2 = inlined_call_operand.hbm [shape: f32[16,24], index: 2, kind: input, shape index: {}]   ;;  %s1287_s3 = inlined_call_operand.vmem [shape: f32[16,1], index: 3, kind: input, shape index: {}]   ;;  %s1288_s4 = inlined_call_operand.vmem [shape: f32[16,8], index: 4, kind: input, shape index: {}]   ;;  %s1289_s5 = inlined_call_operand.vmem [shape: f32[16,1], index: 5, kind: input, shape index: {}]   ;;  %s1290_s6 = inlined_call_operand.hbm [shape: f32[8,256], index: 6, kind: output, shape index: {0}]   ;;  %s1291_s7 = inlined_call_operand.hbm [shape: f32[8,256], index: 7, kind: output, shape index: {1}]  }
   0x1   :  { %1296 = sst [smem:[#allocation16_spill]] %s1284_s0 }
   0x2   :  { %1297 = sst [smem:[#allocation17_spill]] %s1286_s2 }
   0x3   :  { %13 = vsyncpa [#allocation4], 0 }
   0x4   :  { %15 = vsyncpa [#allocation4 + $0x1], 0 }
   0x5   :  { %16 = vsyncpa [#allocation7], 0 }
   0x6   :  { %17 = vsyncpa [#allocation5], 0 }
   0x7   :  { %19 = vsyncpa [#allocation5 + $0x1], 0 }
   0x8   :  { %20 = vsyncpa [#allocation10], 0 }
   0x9   :  { %22 = vsyncpa [#allocation10 + $0x1], 0  ;;  %s1061_s24 = smov 0   ;;  %s1063_s25 = smov 0  }
   0xa   :  { %s1065_s26 = smov 0   ;;  %s1067_s27 = smov 0  }
   0xb LB: > { %s1082_s28 = sadd.s32 4294967295, %s1012_s27   ;;  %s750_s29 = sadd.s32 4294967294, %s1012_s27   ;;  %s1012_s27 = sphi %s1067_s27, %s1316_s27   ;;  %s1008_s26 = sphi %s1065_s26, %s1315_s26   ;;  %s1004_s25 = sphi %s1063_s25, %s1314_s25   ;;  %s1000_s24 = sphi %s1061_s24, %s1313_s24  }
   0xc   : > { %s1086_s30 = sadd.s32 1, %s1012_s27   ;;  %s35_s8 = sadd.s32 1, %s1008_s26 }
   0xd   : > { %s32_s9 = ssub.s32 %s1012_s27, %s1086_s30  ;;  %p42_p0 = scmp.ne.s32.totalorder %s1008_s26, %s1004_s25 }
   0xe   : > { %p33_p1 = scmp.eq.s32.totalorder %s32_s9, 0  ;;  %p43_p2 = scmp.eq.s32.totalorder %s1012_s27, 0 }
   0xf   : > { %p74_p3 = scmp.ne.s32.totalorder %s1004_s25, %s1000_s24  ;;  %p1295_p4 = scmp.eq.s32.totalorder %s1082_s28, 0 }
  0x10   : > { %s1098_s10 = scalar_select %p33_p1, %s1008_s26, %s35_s8  }
  0x11   : > { %p1100_p5 = por %p43_p2, %p42_p0  ;;  %p1106_p6 = por %p1295_p4, %p74_p3 }
  0x12   : > { %1298 = sst [smem:[#allocation15_spill]] %s1098_s10  ;;  %p182_p7 = scmp.eq.s32.totalorder %s1082_s28, 1 }
  0x13   : > { %s1300_s12 = scalar_select %p1106_p6, 1, 0 }
  0x14   : > { %p188_p8 = scmp.eq.s32.totalorder %s750_s29, 1  ;;  %p751_p9 = scmp.ge.s32.totalorder %s1012_s27, 1 }
  0x15   : > { %p221_p10 = scmp.lt.s32.totalorder %s1012_s27, 3  ;;  %p1113_p11 = por %p182_p7, %p42_p0 }
  0x16   : > { %p1117_p12 = por %p188_p8, %p74_p3  ;;  %s1014_s16 = smov [#allocation6]  }
  0x17   : > { %s1301_s13 = scalar_select %p1113_p11, 1, 0 }
  0x18   : > { %s1302_s14 = scalar_select %p1117_p12, 1, 0 }
  0x19   : > { %p1121_p13 = pnand %p751_p9, %p221_p10  ;;  %s233_s17 = sshll.u32 %s1014_s16, 4  ;;  %s234_s17 = int_to_ptr.vmem [resolvable:$true] %s233_s17 }
  0x1a   : > { %s873_s18 = scalar_lea.vmem %s234_s17, 256  ;;  %p881_p8 = scmp.lt.s32.totalorder %s234_s17, %s234_s17 }
  0x1b   : > { %p806_p1 = pneg %p1121_p13  ;;  %p874_p7 = scmp.ne.s32.totalorder %s234_s17, %s873_s18 }
  0x1c   : > { %p882_p6 = scmp.lt.s32.totalorder %s873_s18, %s873_s18 }
  0x1d   : > { %p807_p2 = pnand %p806_p1, %p1295_p4 }
  0x1e   : > { %p883_p12 = por %p882_p6, %p881_p8 }
  0x1f   : > { %p864_p0 = pneg %p807_p2 }
  0x21   : > { %p876_p11 = pnand %p874_p7, %p864_p0 }
  0x23   : > { %p877_p3 = pneg %p876_p11 }
  0x25   : > { %p884_p9 = pnand %p883_p12, %p877_p3 }
  0x27   : > { %887 = shalt.err (!%p884_p9)
}
  0x28   : > { %s1015_s19 = smov 128   ;;  %s1016_s20 = smov 8  }
  0x29   : > { %s1304_s2 = sld [smem:[#allocation17_spill]]  ;;  %p1294_p10 = scmp.ge.s32.totalorder %s1012_s27, 2 }
  0x2b   : > { %252 = sbr.rel (%p1294_p10) target bundleno = 84 (0x54), region = 32 }
  0x2f   : > { %809 = dma.hbm_to_vmem [thread:$0]  (!%p807_p2), %s1304_s2, 256, %s234_s17, [#allocation7], %s1015_s19, %s1015_s19, %s1016_s20  }
  0x30   : > { %255 = sbr.rel (!%p1100_p5) target bundleno = 60 (0x3c), region = 36  ;;  %s257_s23 = sand.u32 (%p1100_p5), 1, %s1008_s26  }
  0x31   : > { %s754_s29 = sshll.u32 (%p1100_p5), %s1012_s27, 3  ;;  %s794_s8 = smul.u32 (%p1100_p5), 24, %s257_s23 }
  0x32   : > { %s1305_s0 = sld [smem:[#allocation16_spill]] (%p1100_p5) }
  0x33   : > { %s259_s17 = scalar_lea.vmem (%p1100_p5), [#allocation2], %s794_s8 }
  0x38   : > { %s261_s18 = scalar_lea.vmem %s1305_s0, %s754_s29 }
  0x39   : > { %v294_v0 = vld [vmem:[%s261_s18] sm:$0xff]  ;;  %v296_v1 = vld [vmem:[%s261_s18 + $0x10] sm:$0xff] }
  0x3a   : > { %v298_v2 = vld [vmem:[%s261_s18 + $0x20] sm:$0xff]  ;;  %295 = vst [vmem:[%s259_s17] sm:$0xff] %v294_v0  ;;  %297 = vst [vmem:[%s259_s17 + $0x8] sm:$0xff] %v296_v1 }
  0x3b   : > { %299 = vst [vmem:[%s259_s17 + $0x10] sm:$0xff] %v298_v2 }
  0x3c PF: > { %s306_s19 = sand.u32 1, %s1008_s26   ;;  %s756_s20 = sshll.u32 %s1012_s27, 7 }
  0x3d   : > { %s755_s21 = sshll.u32 %s306_s19, 3  ;;  %s1147_s2 = scalar_lea.hbm %s1285_s1, %s756_s20 }
  0x3e   : > { %s310_s29 = scalar_lea.vmem [#allocation3], %s755_s21  ;;  %s307_s9 = scalar_lea.sflag [#allocation4], %s306_s19 }
  0x3f   : > { %s317_s8 = sshll.u32 %s310_s29, 4  ;;  %s888_s16 = scalar_lea.hbm %s1147_s2, 128  ;;  %s318_s8 = int_to_ptr.vmem [resolvable:$true] %s317_s8 }
  0x40   : > { %p889_p6 = scmp.ne.s32.totalorder %s1147_s2, %s888_s16  ;;  %s892_s0 = scalar_lea.hbm %s1285_s1, 256 }
  0x41   : > { %p893_p1 = scmp.lt.s32.totalorder %s1147_s2, %s1285_s1  ;;  %p894_p2 = scmp.lt.s32.totalorder %s892_s0, %s888_s16 }
  0x42   : > { %p890_p11 = pnand %p889_p6, %p1100_p5 }
  0x43   : > { %p895_p0 = por %p894_p2, %p893_p1 }
  0x44   : > { %p891_p12 = pneg %p890_p11 }
  0x46   : > { %p896_p7 = pnand %p895_p0, %p891_p12 }
  0x48   : > { %899 = shalt.err (!%p896_p7)
}
  0x49   : > { %s900_s20 = scalar_lea.vmem %s318_s8, 128  ;;  %s1017_s19 = smov [#allocation3]  }
  0x4a   : > { %p901_p3 = scmp.ne.s32.totalorder %s318_s8, %s900_s20  ;;  %s904_s21 = sshll.u32 %s1017_s19, 4  ;;  %s905_s21 = int_to_ptr.vmem [resolvable:$false] %s904_s21 }
  0x4b   : > { %s906_s23 = scalar_lea.vmem %s905_s21, 256  ;;  %p907_p6 = scmp.lt.s32.totalorder %s318_s8, %s905_s21 }
  0x4c   : > { %p902_p8 = pnand %p901_p3, %p1100_p5  ;;  %p908_p11 = scmp.lt.s32.totalorder %s906_s23, %s900_s20 }
  0x4e   : > { %p903_p9 = pneg %p902_p8  ;;  %p909_p10 = por %p908_p11, %p907_p6 }
  0x50   : > { %p910_p4 = pnand %p909_p10, %p903_p9 }
  0x52   : > { %913 = shalt.err (!%p910_p4)
}
  0x53   : > { %798 = dma.hbm_to_vmem [thread:$0]  (%p1100_p5), %s1147_s2, 128, %s318_s8, %s307_s9  }
  0x54 PF: > { %326 = sbr.rel (%p1121_p13) target bundleno = 550 (0x226), region = 78  ;;  %s1168_s0 = sand.u32 (!%p1121_p13), 1, %s1004_s25  }
  0x55   : > { %s795_s10 = smul.u32 (!%p1121_p13), 24, %s1168_s0  ;;  %s1172_s29 = sshll.u32 (!%p1121_p13), %s1168_s0, 3 }
  0x56   : > { %s336_s18 = scalar_lea.sflag (!%p1121_p13), [#allocation4], %s1168_s0  ;;  %s339_s11 = scalar_lea.vmem (!%p1121_p13), [#allocation3], %s1172_s29 }
  0x57   : > { %s331_s16 = scalar_lea.vmem (!%p1121_p13), [#allocation2], %s795_s10  ;;  %p1306_p4 = scmp.ne.s32.totalorder (!%p1121_p13), %s1300_s12, 0 }
  0x59   : > { %983 = dma.done.wait (%p1306_p4), %s336_s18, 128  }
  0x5a   : > { %985 = vsyncadd (%p1306_p4), %s336_s18, 4294967168  ;;  %p1307_p5 = scmp.eq.s32.totalorder %s1082_s28, 0 }
  0x5c   : > { %987 = dma.done.wait (%p1307_p5), [#allocation7], 256   ;;  %p1308_p13 = pmov %p1307_p5 }
  0x5d   : > { %v1018_v3 = vmov 0   ;;  %vm400_vm0 = vcmask 195584   ;;  %v387_v4 = vld [vmem:[%s331_s16 + $0x10] sm:$0xff]  ;;  %v386_v5 = vld [vmem:[%s331_s16 + $0x8] sm:$0xff]  ;;  %v385_v8 = vld [vmem:[%s331_s16] sm:$0xff]  ;;  %vm502_vm1 = vcmask 64512  }
  0x5e   : > { %989 = vsyncadd (%p1308_p13), [#allocation7], 4294967040  ;;  %856 = vset.pattern.permute.xlu0 %v1018_v3  ;;  %857 = vset.pattern.permute.xlu1 %v1018_v3  ;;  %v383_v6 = vld [vmem:[#allocation6] sm:$0xff]  ;;  %v389_v7 = vld [vmem:[%s1287_s3 + $0x8] sm:$0xff]  ;;  %s768_s16 = sshll.u32 %s1082_s28, 7  ;;  %s382_s18 = scalar_lea.vmem [#allocation9], %s1172_s29 }
  0x5f   : > { %780 = vmatprep.subr.mxu0 %v387_v4  ;;  %786 = vmatprep.mubr.msk.f32.mxu0 %vm400_vm0, %v383_v6  ;;  %v384_v9 = vld [vmem:[#allocation6 + $0x8] sm:$0xff]  ;;  %v388_v10 = vld [vmem:[%s1287_s3] sm:$0xff]  ;;  %s620_s2 = sshll.u32 %s382_s18, 4  ;;  %s1213_s8 = scalar_lea.hbm %s1291_s7, %s768_s16  ;;  %v584_v32 = vld [vmem:[%s339_s11] sm:$0xff]  ;;  %s1215_s2 = int_to_ptr.vmem [resolvable:$true] %s620_s2 }
  0x60   : > { %781 = vmatpush3.msra.mxu0 %v387_v4  ;;  %397 = vperm.xlu0 %856, %v389_v7   ;;  %v488_v11 = vld [vmem:[%s1288_s4] sm:$0xff]  ;;  %v491_v13 = vld [vmem:[%s1289_s5 + $0x8] sm:$0xff]  ;;  %s375_s9 = scalar_lea.vmem [#allocation8], %s1172_s29  ;;  %s594_s22 = scalar_lea.sflag [#allocation10], %s1168_s0 }
  0x61   : > { %782 = vmatprep.subr.mxu0 %v386_v5  ;;  %791 = vmatprep.mubr.msk.f32.mxu1 %vm502_vm1, %v488_v11  ;;  %v490_v12 = vld [vmem:[%s1289_s5] sm:$0xff]  ;;  %v489_v26 = vld [vmem:[%s1288_s4 + $0x8] sm:$0xff]  ;;  %s1222_s17 = sshll.u32 %s375_s9, 4  ;;  %s914_s20 = scalar_lea.vmem %s1215_s2, 128  ;;  %s608_s17 = int_to_ptr.vmem [resolvable:$true] %s1222_s17 }
  0x62   : > { %783 = vmatpush3.msra.mxu0 %v386_v5  ;;  %494 = vperm.xlu1 %857, %v490_v12   ;;  %p915_p10 = scmp.ne.s32.totalorder %s1215_s2, %s914_s20  ;;  %p1309_p12 = scmp.ne.s32.totalorder %s1301_s13, 0 }
  0x63   : > { %784 = vmatprep.subr.mxu0 %v385_v8  ;;  %s1019_s19 = smov [#allocation9]  }
  0x64   : > { %785 = vmatpush3.msra.mxu0 %v385_v8  ;;  %392 = vperm.xlu0 %856, %v388_v10   ;;  %p916_p1 = pnand %p915_p10, %p1309_p12  ;;  %s918_s21 = sshll.u32 %s1019_s19, 4  ;;  %s919_s21 = int_to_ptr.vmem [resolvable:$false] %s918_s21 }
  0x65   : > { %787 = vmatmul.mubr.msk.f32.vlgmr.msra.gmra.mxu0 %vm400_vm0, %v384_v9  ;;  %s920_s23 = scalar_lea.vmem %s919_s21, 256  ;;  %p921_p0 = scmp.lt.s32.totalorder %s1215_s2, %s919_s21 }
  0x66   : > { %499 = vperm.xlu1 %857, %v491_v13   ;;  %p917_p2 = pneg %p916_p1  ;;  %p922_p7 = scmp.lt.s32.totalorder %s920_s23, %s914_s20 }
  0x68   : > { %p923_p3 = por %p922_p7, %p921_p0 }
  0x6a   : > { %p924_p8 = pnand %p923_p3, %p917_p2 }
  0xdb   : > { %v398_v14 = vpop.permute.xlu0 %397 }
  0xdd   : > { %v495_v27 = vpop.permute.xlu1 %494 }
  0xdf   : > { %v393_v19 = vpop.permute.xlu0 %392 }
  0xe1   : > { %v500_v28 = vpop.permute.xlu1 %499 }
 0x125   : > { %v788_v15 = vpop.f32.mrf.mxu0 }
 0x126   : > { %v479_v16 = vadd.f32 %v788_v15, %v398_v14 }
 0x127   : > { %v473_v17 = vpop.f32.mrf.mxu0 }
 0x128   : > { %v483_v18 = vmul.f32 0.5, %v479_v16  ;;  %v474_v20 = vadd.f32 %v473_v17, %v393_v19 }
 0x12a   : > { %858 = vtanh.f32 %v483_v18 }
 0x12b   : > { %860 = vtanh.f32 %v474_v20 }
 0x137   : > { %v859_v21 = vpop.eup %858 }
 0x138   : > { %v485_v22 = vadd.f32 1.0, %v859_v21  ;;  %v861_v24 = vpop.eup %860 }
 0x13a   : > { %v486_v23 = vmul.f32 0.5, %v485_v22 }
 0x13c   : > { %v487_v25 = vmul.f32 %v861_v24, %v486_v23 }
 0x13e   : > { %789 = vmatprep.subr.mxu1 %v487_v25 }
 0x13f   : > { %790 = vmatpush3.msra.mxu1 %v487_v25 }
 0x140   : > { %792 = vmatmul.mubr.msk.f32.vlgmr.msra.gmra.mxu1 %vm502_vm1, %v489_v26 }
 0x200   : > { %v793_v29 = vpop.f32.mrf.mxu1 }
 0x201   : > { %v581_v30 = vadd.f32 %v793_v29, %v500_v28 }
 0x202   : > { %v575_v31 = vpop.f32.mrf.mxu1 }
 0x203   : > { %587 = vst [vmem:[%s382_s18] sm:$0xff] %v581_v30  ;;  %v576_v33 = vadd.f32 %v575_v31, %v495_v27 }
 0x204   : > { %927 = shalt.err (!%p924_p8)
}
 0x205   : > { %s928_s11 = scalar_lea.hbm %s1213_s8, 128  ;;  %s932_s15 = scalar_lea.hbm %s1291_s7, 256 }
 0x206   : > { %p929_p9 = scmp.ne.s32.totalorder %s1213_s8, %s928_s11  ;;  %p933_p4 = scmp.lt.s32.totalorder %s1213_s8, %s1291_s7 }
 0x207   : > { %p934_p5 = scmp.lt.s32.totalorder %s932_s15, %s928_s11 }
 0x208   : > { %p930_p6 = pnand %p929_p9, %p1309_p12 }
 0x209   : > { %p935_p13 = por %p934_p5, %p933_p4 }
 0x20a   : > { %p931_p11 = pneg %p930_p6 }
 0x20c   : > { %p936_p10 = pnand %p935_p13, %p931_p11 }
 0x20e   : > { %939 = shalt.err (!%p936_p10)
}
 0x20f   : > { %803 = dma.vmem_to_hbm [thread:$0]  (%p1309_p12), %s1215_s2, 128, %s1213_s8, %s594_s22   ;;  %v585_v34 = vadd.f32 %v584_v32, %v576_v33 }
 0x210   : > { %s605_s23 = scalar_lea.hbm %s1290_s6, %s768_s16  ;;  %s589_s11 = scalar_lea.sflag [#allocation5], %s1168_s0 }
 0x211   : > { %586 = vst [vmem:[%s375_s9] sm:$0xff] %v585_v34  ;;  %s940_s10 = scalar_lea.vmem %s608_s17, 128  ;;  %s1020_s18 = smov [#allocation8]  }
 0x212   : > { %p941_p1 = scmp.ne.s32.totalorder %s608_s17, %s940_s10  ;;  %s944_s15 = sshll.u32 %s1020_s18, 4  ;;  %s945_s15 = int_to_ptr.vmem [resolvable:$false] %s944_s15 }
 0x213   : > { %s946_s12 = scalar_lea.vmem %s945_s15, 256  ;;  %p947_p7 = scmp.lt.s32.totalorder %s608_s17, %s945_s15 }
 0x214   : > { %p942_p2 = pnand %p941_p1, %p1309_p12  ;;  %p948_p3 = scmp.lt.s32.totalorder %s946_s12, %s940_s10 }
 0x216   : > { %p943_p0 = pneg %p942_p2  ;;  %p949_p8 = por %p948_p3, %p947_p7 }
 0x218   : > { %p950_p9 = pnand %p949_p8, %p943_p0 }
 0x21a   : > { %953 = shalt.err (!%p950_p9)
}
 0x21b   : > { %s954_s28 = scalar_lea.hbm %s605_s23, 128  ;;  %s958_s16 = scalar_lea.hbm %s1290_s6, 256 }
 0x21c   : > { %p955_p6 = scmp.ne.s32.totalorder %s605_s23, %s954_s28  ;;  %p959_p5 = scmp.lt.s32.totalorder %s605_s23, %s1290_s6 }
 0x21d   : > { %p960_p13 = scmp.lt.s32.totalorder %s958_s16, %s954_s28 }
 0x21e   : > { %p956_p11 = pnand %p955_p6, %p1309_p12 }
 0x21f   : > { %p961_p10 = por %p960_p13, %p959_p5 }
 0x220   : > { %p957_p4 = pneg %p956_p11 }
 0x222   : > { %p962_p1 = pnand %p961_p10, %p957_p4 }
 0x224   : > { %965 = shalt.err (!%p962_p1)
}
 0x225   : > { %802 = dma.vmem_to_hbm [thread:$0]  (%p1309_p12), %s608_s17, 128, %s605_s23, %s589_s11  }
 0x226 PF: > { %s632_s9 = sand.u32 1, %s1000_s24   ;;  %p1310_p2 = scmp.ne.s32.totalorder %s1302_s14, 0 }
 0x227   : > { %p1311_p0 = scmp.ge.s32.totalorder %s1012_s27, 2  ;;  %s633_s22 = scalar_lea.sflag [#allocation5], %s632_s9 }
 0x229   : > { %p811_p7 = pnand %p1311_p0, %p1310_p2 }
 0x22b   : > { %p812_p3 = pneg %p811_p7 }
 0x22d   : > { %991 = dma.done.wait (%p812_p3), %s633_s22, 128  }
 0x22e   : > { %993 = vsyncadd (%p812_p3), %s633_s22, 4294967168  ;;  %s642_s19 = scalar_lea.sflag [#allocation10], %s632_s9 }
 0x22f   : > { %995 = dma.done.wait (%p812_p3), %s642_s19, 128  }
 0x230   : > { %997 = vsyncadd (%p812_p3), %s642_s19, 4294967168  ;;  %s1312_s13 = sld [smem:[#allocation15_spill]]  ;;  %p25_p12 = scmp.ge.s32.totalorder %s1086_s30, 4  }
 0x231   : > { %s1313_s24 = smov %s1004_s25  ;;  %s1314_s25 = smov %s1008_s26 }
 0x232   : > { %s1316_s27 = smov %s1086_s30  ;;  %27 = sbr.rel (!%p25_p12) target bundleno = 11 (0xb), region = 156 }
 0x236   : > { %s1315_s26 = smov %s1312_s13 }
 0x237   :  { %647 = vsyncpa [#allocation4], 1 }
 0x238   :  { %649 = vsyncpa [#allocation4 + $0x1], 1 }
 0x239   :  { %650 = vsyncpa [#allocation7], 1 }
 0x23a   :  { %651 = vsyncpa [#allocation5], 1 }
 0x23b   :  { %653 = vsyncpa [#allocation5 + $0x1], 1 }
 0x23c   :  { %654 = vsyncpa [#allocation10], 1 }
 0x23d   :  { %656 = vsyncpa [#allocation10 + $0x1], 1 }

</bundles_post_ra>
